<compile_context>
chip_gen: v7x
topology: tpu7x:2x2x1
jax: 0.10.0
libtpu: 0.0.40
codegen_flags: <defaults>
</compile_context>

<pallas_src>
import math

import jax
import jax.numpy as jnp
from jax.experimental import pallas as pl
from jax.experimental.pallas import tpu as pltpu

_LANES = 128                          # TPU lane width (last dim multiple)
_MAX_BLOCK_BYTES = 4 * 1024 * 1024    # ~4 MiB per block; in+out double-buffered ~16 MiB
_VMEM_LIMIT_BYTES = 32 * 1024 * 1024  # raise v5e's 16 MiB scoped default; safe on v6e/v7x
_PALLAS_MIN_ELEMS = 64 * 1024         # below this, fused XLA maximum beats a kernel launch


def _relu_kernel(x_ref, o_ref):
    # Elementwise ReLU on a lane-dense (row_tile, 128) tile — pure VPU work, HBM-BW bound.
    o_ref[...] = jnp.maximum(x_ref[...], 0)


def _round_up(n: int, m: int) -> int:
    return ((n + m - 1) // m) * m


def _sublanes(dtype) -> int:
    # f32 -> 8, bf16/f16 -> 16, int8/fp8 -> 32 (packed-sublane granularity).
    itemsize = jnp.dtype(dtype).itemsize
    return max(8, 32 // max(itemsize, 1))


def relu(x: jax.Array, *, min_pallas_elems: int = _PALLAS_MIN_ELEMS) -> jax.Array:
    """Pallas TPU ReLU matching nn.ReLU() semantics (elementwise, same shape/dtype)."""
    orig_shape = x.shape
    n = math.prod(orig_shape) if orig_shape else 1

    # Small-input fast path (covers the spec's torch.randn(2)): no kernel launch,
    # no reshape/pad plumbing — XLA fuses this elementwise op for free.
    if n < min_pallas_elems:
        return jnp.maximum(x, jnp.zeros((), dtype=x.dtype))

    itemsize = jnp.dtype(x.dtype).itemsize
    sub = _sublanes(x.dtype)
    align = sub * _LANES  # flat-length alignment that keeps rows a sublane multiple

    n_padded = _round_up(n, align)
    padded = n_padded != n

    flat = x.reshape(-1)
    if padded:
        # Only non-aligned shapes pay this copy; relu(0) == 0, tail sliced off below.
        flat = jnp.pad(flat, (0, n_padded - n))

    rows = n_padded // _LANES                      # multiple of `sub`
    max_rows = _MAX_BLOCK_BYTES // (_LANES * itemsize)  # 8192 f32 / 16384 bf16 / 32768 i8
    row_tile = min(rows, max_rows)                 # also a multiple of `sub`
    x2d = flat.reshape(rows, _LANES)               # lane/sublane-dense 2-D slab

    grid = (pl.cdiv(rows, row_tile),)              # partial last block handled by Pallas
    out2d = pl.pallas_call(
        _relu_kernel,
        out_shape=jax.ShapeDtypeStruct(x2d.shape, x2d.dtype),
        grid=grid,
        in_specs=[pl.BlockSpec((row_tile, _LANES), lambda i: (i, 0))],
        out_specs=pl.BlockSpec((row_tile, _LANES), lambda i: (i, 0)),
        compiler_params=pltpu.CompilerParams(
            # Independent row tiles: shard across TensorCores where available (v7x).
            dimension_semantics=("parallel",),
            vmem_limit_bytes=_VMEM_LIMIT_BYTES,
        ),
    )(x2d)

    out_flat = out2d.reshape(-1)
    if padded:
        out_flat = out_flat[:n]
    return out_flat.reshape(orig_shape)


if __name__ == "__main__":
    key = jax.random.PRNGKey(0)
    k1, k2, k3 = jax.random.split(key, 3)

    # 1) The literal spec: torch.randn(2) — small-input fast path.
    x_tiny = jax.random.normal(k1, (2,), dtype=jnp.float32)
    out_tiny = jax.block_until_ready(relu(x_tiny))
    assert out_tiny.shape == x_tiny.shape and out_tiny.dtype == x_tiny.dtype
    assert bool(jnp.allclose(out_tiny, jnp.maximum(x_tiny, 0.0))), "tiny-path mismatch"

    # 2) Small vreg-dense tensor, kernel path forced (exercises the aligned, no-pad route).
    x_dense = jax.random.normal(k2, (2, 4, 16, 16), dtype=jnp.float32)  # 2048 elems
    out_dense = jax.block_until_ready(relu(x_dense, min_pallas_elems=0))
    assert out_dense.shape == x_dense.shape and out_dense.dtype == x_dense.dtype
    assert bool(jnp.allclose(out_dense, jnp.maximum(x_dense, 0.0))), "dense-path mismatch"

    # 3) Unaligned shape, kernel path forced (exercises pad + slice-back route).
    x_odd = jax.random.normal(k3, (37, 50), dtype=jnp.float32)  # 1850 elems
    out_odd = jax.block_until_ready(relu(x_odd, min_pallas_elems=0))
    assert out_odd.shape == x_odd.shape and out_odd.dtype == x_odd.dtype
    assert bool(jnp.allclose(out_odd, jnp.maximum(x_odd, 0.0))), "padded-path mismatch"

    print("KERNEL_OK")
</pallas_src>

<mosaic_0001>
module attributes {stable_mosaic.version = 11 : i64} {
  func.func @_relu_kernel(%arg0: i32, %arg1: memref<16x128xf32, #tpu.memory_space<vmem>>, %arg2: memref<16x128xf32, #tpu.memory_space<vmem>>) attributes {dimension_semantics = [#tpu.dimension_semantics<parallel>], iteration_bounds = array<i64: 1>, scalar_prefetch = 0 : i64, scratch_operands = 0 : i64, tpu.core_type = #tpu.core_type<tc>, window_params = [{transform_indices = @transform_0, window_bounds = array<i64: 16, 128>}, {transform_indices = @transform_1, window_bounds = array<i64: 16, 128>}]} {
    %c0 = arith.constant 0 : index
    %c0_0 = arith.constant 0 : index
    %0 = vector.load %arg1[%c0, %c0_0] : memref<16x128xf32, #tpu.memory_space<vmem>>, vector<16x128xf32>
    %cst = arith.constant 0.000000e+00 : f32
    %1 = vector.broadcast %cst : f32 to vector<16x128xf32>
    %2 = arith.maximumf %0, %1 : vector<16x128xf32>
    %c0_1 = arith.constant 0 : index
    %c0_2 = arith.constant 0 : index
    %3 = vector.load %arg2[%c0_1, %c0_2] : memref<16x128xf32, #tpu.memory_space<vmem>>, vector<16x128xf32>
    tpu.vector_store %arg2[%c0_1, %c0_2], %2 {strides = array<i32>} : memref<16x128xf32, #tpu.memory_space<vmem>>, vector<16x128xf32>,
    return
  }
  func.func @transform_0(%arg0: i32) -> (i32, i32) {
    %c0_i32 = arith.constant 0 : i32
    %c0_i32_0 = arith.constant 0 : i32
    return %arg0, %c0_i32 : i32, i32
  }
  func.func @transform_1(%arg0: i32) -> (i32, i32) {
    %c0_i32 = arith.constant 0 : i32
    %c0_i32_0 = arith.constant 0 : i32
    return %arg0, %c0_i32 : i32, i32
  }
}

</mosaic_0001>

<bundles_post_ra>
// kernel: tpu_custom_call.1
= control target key start
LH: loop header
LB: loop body
LE: loop exit
PB: predicated region body
PF: predicated region fallthrough
CT: control target
= control target key end

     0   :  { %6 = vsyncpa [#allocation3], 0  ;;  %s136_s0 = inlined_call_operand.hbm [shape: f32[16,128], index: 0, kind: input, shape index: {}]   ;;  %s137_s1 = inlined_call_operand.hbm [shape: f32[16,128], index: 1, kind: output, shape index: {}]  }
   0x1   :  { %7 = vsyncpa [#allocation4], 0  ;;  %s98_s6 = smov [#allocation2]   ;;  %s50_s10 = scalar_lea.hbm %s136_s0, 256 }
   0x2   :  { %s13_s7 = sshll.u32 %s98_s6, 4  ;;  %p51_p0 = scmp.ne.s32.totalorder %s136_s0, %s50_s10  ;;  %s14_s7 = int_to_ptr.vmem [resolvable:$true] %s13_s7 }
   0x3   :  { %p54_p1 = scmp.lt.u32.totalorder %s50_s10, %s136_s0 }
   0x5   :  { %p56_p2 = pnand %p54_p1, %p51_p0 }
   0x7   :  { %59 = shalt.err (!%p56_p2)
}
   0x8   :  { %s60_s15 = scalar_lea.vmem %s14_s7, 256  ;;  %p65_p4 = scmp.lt.s32.totalorder %s14_s7, %s14_s7 }
   0x9   :  { %p61_p3 = scmp.ne.s32.totalorder %s14_s7, %s60_s15  ;;  %p66_p5 = scmp.lt.s32.totalorder %s60_s15, %s60_s15 }
   0xb   :  { %p67_p6 = por %p66_p5, %p65_p4 }
   0xd   :  { %p68_p7 = pnand %p67_p6, %p61_p3 }
   0xf   :  { %71 = shalt.err (!%p68_p7)
}
  0x10   :  { %s99_s16 = smov 128   ;;  %s100_s17 = smov 8  }
  0x11   :  { %19 = dma.hbm_to_vmem [thread:$0]  %s136_s0, 256, %s14_s7, [#allocation3], %s99_s16, %s99_s16, %s100_s17  }
  0x12   :  { %94 = dma.done.wait [#allocation3], 256  }
  0x13   :  { %95 = vsyncadd [#allocation3], 4294967040  ;;  %s101_s20 = smov [#allocation5]   ;;  %v23_v0 = vld [vmem:[#allocation2] sm:$0xff]  ;;  %v24_v1 = vld [vmem:[#allocation2 + $0x8] sm:$0xff] }
  0x14   :  { %s34_s21 = sshll.u32 %s101_s20, 4  ;;  %v25_v2 = vmax.f32 %v23_v0, 0.0  ;;  %v26_v3 = vmax.f32 %v24_v1, 0.0  ;;  %s35_s21 = int_to_ptr.vmem [resolvable:$true] %s34_s21 }
  0x15   :  { %s72_s22 = scalar_lea.vmem %s35_s21, 256  ;;  %p77_p9 = scmp.lt.s32.totalorder %s35_s21, %s35_s21 }
  0x16   :  { %27 = vst [vmem:[#allocation5] sm:$0xff] %v25_v2  ;;  %28 = vst [vmem:[#allocation5 + $0x8] sm:$0xff] %v26_v3  ;;  %p73_p8 = scmp.ne.s32.totalorder %s35_s21, %s72_s22  ;;  %p78_p10 = scmp.lt.s32.totalorder %s72_s22, %s72_s22 }
  0x18   :  { %p79_p11 = por %p78_p10, %p77_p9 }
  0x1a   :  { %p80_p12 = pnand %p79_p11, %p73_p8 }
  0x1c   :  { %83 = shalt.err (!%p80_p12)
}
  0x1d   :  { %s84_s24 = scalar_lea.hbm %s137_s1, 256 }
  0x1e   :  { %p85_p13 = scmp.ne.s32.totalorder %s137_s1, %s84_s24  ;;  %p88_p0 = scmp.lt.u32.totalorder %s84_s24, %s137_s1 }
  0x20   :  { %p90_p1 = pnand %p88_p0, %p85_p13 }
  0x22   :  { %93 = shalt.err (!%p90_p1)
}
  0x23   :  { %40 = dma.vmem_to_hbm [thread:$0]  %s35_s21, 256, %s137_s1, [#allocation4], %s99_s16, %s99_s16, %s100_s17  }
  0x24   :  { %96 = dma.done.wait [#allocation4], 256  }
  0x25   :  { %97 = vsyncadd [#allocation4], 4294967040 }
  0x26   :  { %44 = vsyncpa [#allocation3], 1 }
  0x27   :  { %45 = vsyncpa [#allocation4], 1 }

</bundles_post_ra>
